<compile_context>
chip_gen: v7x
topology: tpu7x:2x2x1
jax: 0.10.0
libtpu: 0.0.40
codegen_flags: <defaults>
</compile_context>

<pallas_src>
import functools

import jax
import jax.numpy as jnp
from jax import lax
from jax.experimental import pallas as pl
from jax.experimental.pallas import tpu as pltpu


def _round_up(x, m):
    return (x + m - 1) // m * m


def _pick_tb(B, N, D, itemsize, block_rows, vmem_budget_bytes):
    """Batch-tile rows: fit a double-buffered tile in the VMEM budget, keep >= 2 tiles."""
    d_lanes = _round_up(D, 128)
    n_sub = _round_up(max(N, 1), 8)
    # Padded VMEM bytes per batch row: anchor + positive (1 -> 8 sublane pad each),
    # negatives (N -> n_sub sublane pad), f32 (row, 128) output.
    per_row = (8 + 8 + n_sub) * d_lanes * itemsize + 128 * 4
    cap = max(8, (vmem_budget_bytes // (2 * per_row)) // 8 * 8)   # x2: double buffering
    tb = min(max(8, block_rows // 8 * 8), cap)
    if B < 16:
        return min(tb, B)            # single small tile; full-dim block is legal
    # Cap at ~B/2 so the "parallel" grid axis has >= 2 tiles (v7x megacore split).
    return min(tb, _round_up(pl.cdiv(B, 2), 8))


def _pick_chunk(tb):
    """In-kernel row-chunk size: multiple of 8 that divides tb, giving <= 8 chunks."""
    if tb < 8 or tb % 8 != 0:
        return tb                    # tiny ragged single-tile batch: one chunk
    c = _round_up(max(8, tb // 8), 8)
    while tb % c != 0:
        c += 8
    return c


def _triplet_softmax_kernel(inv_t_ref, x_ref, pos_ref, neg_ref, out_ref, *,
                            rows_per_chunk):
    """One batch tile.

    inv_t_ref: SMEM (1,) f32          -- 1 / temperature (scalar prefetch)
    x_ref:     VMEM (tb, 1, D)        -- anchor embeddings (one (1, D) slab per row)
    pos_ref:   VMEM (tb, 1, D)        -- positive embeddings
    neg_ref:   VMEM (tb, N, D)        -- negative embeddings
    out_ref:   VMEM (tb, 128)         -- per-example loss broadcast across lanes
    """
    f32 = jnp.float32
    inv_t = inv_t_ref[0]             # f32 scalar
    inv_eps = f32(1e8)               # 1/eps, eps = 1e-8 (torch.cosine_similarity default)

    tb = out_ref.shape[0]
    lanes = out_ref.shape[1]
    n_chunks = tb // rows_per_chunk

    def one_chunk(r):
        rc = rows_per_chunk
        x = x_ref[pl.ds(r, rc)]      # (rc, 1, D), input dtype
        p = pos_ref[pl.ds(r, rc)]    # (rc, 1, D)
        n = neg_ref[pl.ds(r, rc)]    # (rc, N, D)

        # Multiplies stay in the input dtype (bf16-native VALU on v6e/v7x); only the lane
        # reductions accumulate in f32.  The (rc,1,D) * (rc,N,D) broadcast is a sublane
        # broadcast (no relayout).
        sumsq_x = jnp.sum(x * x, axis=-1, dtype=f32)    # (rc, 1)
        sumsq_p = jnp.sum(p * p, axis=-1, dtype=f32)    # (rc, 1)
        sumsq_n = jnp.sum(n * n, axis=-1, dtype=f32)    # (rc, N)
        dot_p = jnp.sum(x * p, axis=-1, dtype=f32)      # (rc, 1)
        dot_n = jnp.sum(x * n, axis=-1, dtype=f32)      # (rc, N)

        # 1 / max(norm, eps) == min(rsqrt(sumsq), 1/eps); rsqrt runs on the EUP slot.
        # 1/temperature is folded into the anchor factor (saves one (rc, N) multiply).
        inv_nx = jnp.minimum(lax.rsqrt(sumsq_x), inv_eps) * inv_t   # (rc, 1)
        inv_np = jnp.minimum(lax.rsqrt(sumsq_p), inv_eps)           # (rc, 1)
        inv_nn = jnp.minimum(lax.rsqrt(sumsq_n), inv_eps)           # (rc, N)

        pos_logit = dot_p * inv_nx * inv_np             # (rc, 1)
        neg_logits = dot_n * inv_nx * inv_nn            # (rc, N)

        # Stable cross-entropy with label 0 (the positive), no in-kernel concat needed:
        # loss = logsumexp([pos, negs]) - pos.
        m = jnp.maximum(pos_logit, jnp.max(neg_logits, axis=-1, keepdims=True))  # (rc, 1)
        se = jnp.exp(pos_logit - m) + jnp.sum(jnp.exp(neg_logits - m),
                                              axis=-1, keepdims=True)            # (rc, 1)
        per_example = m + jnp.log(se) - pos_logit                                 # (rc, 1)

        out_ref[pl.ds(r, rc)] = jnp.broadcast_to(per_example, (rc, lanes))

    if n_chunks == 1:
        one_chunk(0)
    else:
        def body(ci, carry):
            one_chunk(pl.multiple_of(ci * rows_per_chunk, 8))
            return carry
        lax.fori_loop(0, n_chunks, body, 0, unroll=True)


def triplet_softmax_contrast_loss(text_embeddings, text_embeddings_pos,
                                  text_embeddings_neg, temperature=0.05,
                                  block_rows=256,
                                  vmem_budget_bytes=40 * 1024 * 1024):
    """Forward pass of TripletSoftmaxContrastLoss (add_inbatch_neg=False)."""
    B, D = text_embeddings.shape
    _, N, _ = text_embeddings_neg.shape

    # Free (metadata-only) reshapes; no concatenation, no padding, no HBM copies.
    x3 = text_embeddings.reshape(B, 1, D)
    p3 = text_embeddings_pos.reshape(B, 1, D)

    itemsize = jnp.dtype(text_embeddings.dtype).itemsize
    tb = _pick_tb(B, N, D, itemsize, block_rows, vmem_budget_bytes)
    rows_per_chunk = _pick_chunk(tb)
    num_tiles = pl.cdiv(B, tb)

    inv_t = jnp.asarray([1.0 / temperature], dtype=jnp.float32)
    kernel = functools.partial(_triplet_softmax_kernel, rows_per_chunk=rows_per_chunk)

    per_example = pl.pallas_call(
        kernel,
        out_shape=jax.ShapeDtypeStruct((B, 128), jnp.float32),
        grid_spec=pltpu.PrefetchScalarGridSpec(
            num_scalar_prefetch=1,
            grid=(num_tiles,),
            in_specs=[
                pl.BlockSpec((tb, 1, D), lambda i, inv_t_ref: (i, 0, 0)),
                pl.BlockSpec((tb, 1, D), lambda i, inv_t_ref: (i, 0, 0)),
                pl.BlockSpec((tb, N, D), lambda i, inv_t_ref: (i, 0, 0)),
            ],
            out_specs=pl.BlockSpec((tb, 128), lambda i, inv_t_ref: (i, 0)),
        ),
        compiler_params=pltpu.CompilerParams(
            dimension_semantics=("parallel",),
            vmem_limit_bytes=48 * 1024 * 1024),
    )(inv_t, x3, p3, text_embeddings_neg)

    # Batch mean over per-example losses (padded grid rows are never written to HBM).
    return jnp.mean(per_example[:, 0])


def _reference_loss(x, pos, neg, temperature=0.05):
    eps = 1e-8
    nx = jnp.maximum(jnp.linalg.norm(x, axis=-1), eps)
    npos = jnp.maximum(jnp.linalg.norm(pos, axis=-1), eps)
    nneg = jnp.maximum(jnp.linalg.norm(neg, axis=-1), eps)
    sim_pos = jnp.sum(x * pos, axis=-1) / (nx * npos)                       # (B,)
    sim_neg = jnp.sum(x[:, None, :] * neg, axis=-1) / (nx[:, None] * nneg)  # (B, N)
    sim = jnp.concatenate([sim_pos[:, None], sim_neg], axis=1) / temperature
    lse = jax.scipy.special.logsumexp(sim, axis=-1)
    return jnp.mean(lse - sim[:, 0])


if __name__ == "__main__":
    # Case 1: B multiple of 8, single tile, single in-kernel chunk.
    k1, k2, k3 = jax.random.split(jax.random.PRNGKey(0), 3)
    B, N, D = 8, 4, 32
    x = jax.random.normal(k1, (B, D), dtype=jnp.float32)
    pos = jax.random.normal(k2, (B, D), dtype=jnp.float32)
    neg = jax.random.normal(k3, (B, N, D), dtype=jnp.float32)
    loss = jax.block_until_ready(triplet_softmax_contrast_loss(x, pos, neg, temperature=0.05))
    ref = _reference_loss(x, pos, neg, temperature=0.05)
    assert jnp.allclose(loss, ref, rtol=1e-4, atol=1e-4), (loss, ref)

    # Case 2: ragged tiny batch (B not a multiple of 8): full-dim single tile.
    k4, k5, k6 = jax.random.split(jax.random.PRNGKey(1), 3)
    B2, N2, D2 = 6, 3, 20
    x2 = jax.random.normal(k4, (B2, D2), dtype=jnp.float32)
    pos2 = jax.random.normal(k5, (B2, D2), dtype=jnp.float32)
    neg2 = jax.random.normal(k6, (B2, N2, D2), dtype=jnp.float32)
    loss2 = jax.block_until_ready(triplet_softmax_contrast_loss(x2, pos2, neg2, temperature=0.1))
    ref2 = _reference_loss(x2, pos2, neg2, temperature=0.1)
    assert jnp.allclose(loss2, ref2, rtol=1e-4, atol=1e-4), (loss2, ref2)

    # Case 3: B >= 16 -> two tiles (partial last tile, boundary clipping) and the
    # multi-chunk lax.fori_loop(unroll=True) path inside the kernel.
    k7, k8, k9 = jax.random.split(jax.random.PRNGKey(2), 3)
    B3, N3, D3 = 20, 5, 24
    x3_ = jax.random.normal(k7, (B3, D3), dtype=jnp.float32)
    pos3 = jax.random.normal(k8, (B3, D3), dtype=jnp.float32)
    neg3 = jax.random.normal(k9, (B3, N3, D3), dtype=jnp.float32)
    loss3 = jax.block_until_ready(triplet_softmax_contrast_loss(x3_, pos3, neg3, temperature=0.07))
    ref3 = _reference_loss(x3_, pos3, neg3, temperature=0.07)
    assert jnp.allclose(loss3, ref3, rtol=1e-4, atol=1e-4), (loss3, ref3)

    print("KERNEL_OK")
</pallas_src>

<mosaic_0001>
module attributes {stable_mosaic.version = 11 : i64} {
  func.func @_triplet_softmax_kernel(%arg0: i32, %arg1: memref<1xf32, #tpu.memory_space<smem>>, %arg2: memref<8x1x32xf32, #tpu.memory_space<vmem>>, %arg3: memref<8x1x32xf32, #tpu.memory_space<vmem>>, %arg4: memref<8x4x32xf32, #tpu.memory_space<vmem>>, %arg5: memref<8x128xf32, #tpu.memory_space<vmem>>) attributes {dimension_semantics = [#tpu.dimension_semantics<parallel>], iteration_bounds = array<i64: 1>, scalar_prefetch = 1 : i64, scratch_operands = 0 : i64, tpu.core_type = #tpu.core_type<tc>, window_params = [{transform_indices = @transform_0, window_bounds = array<i64: 8, 1, 32>}, {transform_indices = @transform_1, window_bounds = array<i64: 8, 1, 32>}, {transform_indices = @transform_2, window_bounds = array<i64: 8, 4, 32>}, {transform_indices = @transform_3, window_bounds = array<i64: 8, 128>}]} {
    %c0 = arith.constant 0 : index
    %0 = memref.load %arg1[%c0] : memref<1xf32, #tpu.memory_space<smem>>
    %c0_0 = arith.constant 0 : index
    %c0_1 = arith.constant 0 : index
    %c0_2 = arith.constant 0 : index
    %1 = vector.load %arg2[%c0_0, %c0_1, %c0_2] : memref<8x1x32xf32, #tpu.memory_space<vmem>>, vector<8x1x32xf32>
    %c0_3 = arith.constant 0 : index
    %c0_4 = arith.constant 0 : index
    %c0_5 = arith.constant 0 : index
    %2 = vector.load %arg3[%c0_3, %c0_4, %c0_5] : memref<8x1x32xf32, #tpu.memory_space<vmem>>, vector<8x1x32xf32>
    %c0_6 = arith.constant 0 : index
    %c0_7 = arith.constant 0 : index
    %c0_8 = arith.constant 0 : index
    %3 = vector.load %arg4[%c0_6, %c0_7, %c0_8] : memref<8x4x32xf32, #tpu.memory_space<vmem>>, vector<8x4x32xf32>
    %4 = arith.mulf %1, %1 : vector<8x1x32xf32>
    %cst = arith.constant dense<0.000000e+00> : vector<8x1xf32>
    %5 = vector.multi_reduction <add>, %4, %cst [2] : vector<8x1x32xf32> to vector<8x1xf32>
    %6 = arith.mulf %2, %2 : vector<8x1x32xf32>
    %cst_9 = arith.constant dense<0.000000e+00> : vector<8x1xf32>
    %7 = vector.multi_reduction <add>, %6, %cst_9 [2] : vector<8x1x32xf32> to vector<8x1xf32>
    %8 = arith.mulf %3, %3 : vector<8x4x32xf32>
    %cst_10 = arith.constant dense<0.000000e+00> : vector<8x4xf32>
    %9 = vector.multi_reduction <add>, %8, %cst_10 [2] : vector<8x4x32xf32> to vector<8x4xf32>
    %10 = arith.mulf %1, %2 : vector<8x1x32xf32>
    %cst_11 = arith.constant dense<0.000000e+00> : vector<8x1xf32>
    %11 = vector.multi_reduction <add>, %10, %cst_11 [2] : vector<8x1x32xf32> to vector<8x1xf32>
    %12 = vector.broadcast %1 : vector<8x1x32xf32> to vector<8x4x32xf32>
    %13 = arith.mulf %12, %3 : vector<8x4x32xf32>
    %cst_12 = arith.constant dense<0.000000e+00> : vector<8x4xf32>
    %14 = vector.multi_reduction <add>, %13, %cst_12 [2] : vector<8x4x32xf32> to vector<8x4xf32>
    %15 = math.rsqrt %5 : vector<8x1xf32>
    %cst_13 = arith.constant 1.000000e+08 : f32
    %16 = vector.broadcast %cst_13 : f32 to vector<8x1xf32>
    %17 = arith.minimumf %15, %16 : vector<8x1xf32>
    %18 = vector.broadcast %0 : f32 to vector<8x1xf32>
    %19 = arith.mulf %17, %18 : vector<8x1xf32>
    %20 = math.rsqrt %7 : vector<8x1xf32>
    %cst_14 = arith.constant 1.000000e+08 : f32
    %21 = vector.broadcast %cst_14 : f32 to vector<8x1xf32>
    %22 = arith.minimumf %20, %21 : vector<8x1xf32>
    %23 = math.rsqrt %9 : vector<8x4xf32>
    %cst_15 = arith.constant 1.000000e+08 : f32
    %24 = vector.broadcast %cst_15 : f32 to vector<8x4xf32>
    %25 = arith.minimumf %23, %24 : vector<8x4xf32>
    %26 = arith.mulf %11, %19 : vector<8x1xf32>
    %27 = arith.mulf %26, %22 : vector<8x1xf32>
    %28 = vector.broadcast %19 : vector<8x1xf32> to vector<8x4xf32>
    %29 = arith.mulf %14, %28 : vector<8x4xf32>
    %30 = arith.mulf %29, %25 : vector<8x4xf32>
    %cst_16 = arith.constant dense<0xFF800000> : vector<8xf32>
    %31 = vector.multi_reduction <maximumf>, %30, %cst_16 [1] : vector<8x4xf32> to vector<8xf32>
    %32 = vector.shape_cast %31 : vector<8xf32> to vector<8x1xf32>
    %33 = arith.maximumf %27, %32 : vector<8x1xf32>
    %34 = arith.subf %27, %33 : vector<8x1xf32>
    %35 = math.exp %34 : vector<8x1xf32>
    %36 = vector.broadcast %33 : vector<8x1xf32> to vector<8x4xf32>
    %37 = arith.subf %30, %36 : vector<8x4xf32>
    %38 = math.exp %37 : vector<8x4xf32>
    %cst_17 = arith.constant dense<0.000000e+00> : vector<8xf32>
    %39 = vector.multi_reduction <add>, %38, %cst_17 [1] : vector<8x4xf32> to vector<8xf32>
    %40 = vector.shape_cast %39 : vector<8xf32> to vector<8x1xf32>
    %41 = arith.addf %35, %40 : vector<8x1xf32>
    %42 = math.log %41 : vector<8x1xf32>
    %43 = arith.addf %33, %42 : vector<8x1xf32>
    %44 = arith.subf %43, %27 : vector<8x1xf32>
    %45 = vector.shape_cast %44 : vector<8x1xf32> to vector<8x1xf32>
    %46 = vector.broadcast %45 : vector<8x1xf32> to vector<8x128xf32>
    %c0_18 = arith.constant 0 : index
    %c0_19 = arith.constant 0 : index
    %47 = vector.load %arg5[%c0_18, %c0_19] : memref<8x128xf32, #tpu.memory_space<vmem>>, vector<8x128xf32>
    tpu.vector_store %arg5[%c0_18, %c0_19], %46 {strides = array<i32>} : memref<8x128xf32, #tpu.memory_space<vmem>>, vector<8x128xf32>,
    return
  }
  func.func @transform_0(%arg0: i32, %arg1: memref<1xf32, #tpu.memory_space<smem>>) -> (i32, i32, i32) {
    %c0_i32 = arith.constant 0 : i32
    %c0_i32_0 = arith.constant 0 : i32
    %c0_i32_1 = arith.constant 0 : i32
    return %arg0, %c0_i32, %c0_i32_0 : i32, i32, i32
  }
  func.func @transform_1(%arg0: i32, %arg1: memref<1xf32, #tpu.memory_space<smem>>) -> (i32, i32, i32) {
    %c0_i32 = arith.constant 0 : i32
    %c0_i32_0 = arith.constant 0 : i32
    %c0_i32_1 = arith.constant 0 : i32
    return %arg0, %c0_i32, %c0_i32_0 : i32, i32, i32
  }
  func.func @transform_2(%arg0: i32, %arg1: memref<1xf32, #tpu.memory_space<smem>>) -> (i32, i32, i32) {
    %c0_i32 = arith.constant 0 : i32
    %c0_i32_0 = arith.constant 0 : i32
    %c0_i32_1 = arith.constant 0 : i32
    return %arg0, %c0_i32, %c0_i32_0 : i32, i32, i32
  }
  func.func @transform_3(%arg0: i32, %arg1: memref<1xf32, #tpu.memory_space<smem>>) -> (i32, i32) {
    %c0_i32 = arith.constant 0 : i32
    %c0_i32_0 = arith.constant 0 : i32
    return %arg0, %c0_i32 : i32, i32
  }
}

</mosaic_0001>

<bundles_post_ra>
// kernel: tpu_custom_call.1
= control target key start
LH: loop header
LB: loop body
LE: loop exit
PB: predicated region body
PF: predicated region fallthrough
CT: control target
= control target key end

     0   :  { %10 = vsyncpa [#allocation5], 0  ;;  %s1497_s0 = inlined_call_operand.<no memory space> [shape: f32[1], index: 0, kind: input, shape index: {}]   ;;  %s1498_s1 = inlined_call_operand.hbm [shape: f32[8,1,32], index: 1, kind: input, shape index: {}]   ;;  %s1499_s2 = inlined_call_operand.hbm [shape: f32[8,1,32], index: 2, kind: input, shape index: {}]   ;;  %s1500_s3 = inlined_call_operand.hbm [shape: f32[8,4,32], index: 3, kind: input, shape index: {}]   ;;  %s1501_s4 = inlined_call_operand.hbm [shape: f32[8,128], index: 4, kind: output, shape index: {}]  }
   0x1   :  { %11 = vsyncpa [#allocation8], 0 }
   0x2   :  { %12 = vsyncpa [#allocation6], 0  ;;  %s1050_s15 = smov [#allocation7]   ;;  %s1051_s17 = smov [#allocation4]  }
   0x3   :  { %s30_s16 = sshll.u32 %s1050_s15, 4  ;;  %s18_s18 = sshll.u32 %s1051_s17, 4  ;;  %s31_s16 = int_to_ptr.vmem [resolvable:$true] %s30_s16  ;;  %s1084_s18 = int_to_ptr.vmem [resolvable:$true] %s18_s18 }
   0x4   :  { %s956_s21 = scalar_lea.hbm %s1499_s2, 128 }
   0x5   :  { %p957_p0 = scmp.ne.s32.totalorder %s1499_s2, %s956_s21  ;;  %p960_p1 = scmp.lt.u32.totalorder %s956_s21, %s1499_s2 }
   0x7   :  { %p962_p2 = pnand %p960_p1, %p957_p0 }
   0x9   :  { %965 = shalt.err (!%p962_p2)
}
   0xa   :  { %s966_s26 = scalar_lea.vmem %s31_s16, 128  ;;  %p971_p4 = scmp.lt.s32.totalorder %s31_s16, %s31_s16 }
   0xb   :  { %p967_p3 = scmp.ne.s32.totalorder %s31_s16, %s966_s26  ;;  %p972_p5 = scmp.lt.s32.totalorder %s966_s26, %s966_s26 }
   0xd   :  { %p973_p6 = por %p972_p5, %p971_p4 }
   0xf   :  { %p974_p7 = pnand %p973_p6, %p967_p3 }
  0x11   :  { %977 = shalt.err (!%p974_p7)
}
  0x12   :  { %s1052_s27 = smov 16   ;;  %s1053_s28 = smov 1  }
  0x13   :  { %36 = dma.hbm_to_vmem [thread:$0]  %s1499_s2, 128, %s31_s16, [#allocation8], %s1052_s27, %s1052_s27, %s1053_s28  }
  0x14   :  { %s978_s7 = scalar_lea.hbm %s1498_s1, 128 }
  0x15   :  { %p979_p8 = scmp.ne.s32.totalorder %s1498_s1, %s978_s7  ;;  %p982_p9 = scmp.lt.u32.totalorder %s978_s7, %s1498_s1 }
  0x17   :  { %p984_p10 = pnand %p982_p9, %p979_p8 }
  0x19   :  { %987 = shalt.err (!%p984_p10)
}
  0x1a   :  { %s988_s12 = scalar_lea.vmem %s1084_s18, 128  ;;  %p993_p12 = scmp.lt.s32.totalorder %s1084_s18, %s1084_s18 }
  0x1b   :  { %p989_p11 = scmp.ne.s32.totalorder %s1084_s18, %s988_s12  ;;  %p994_p13 = scmp.lt.s32.totalorder %s988_s12, %s988_s12 }
  0x1d   :  { %p995_p0 = por %p994_p13, %p993_p12 }
  0x1f   :  { %p996_p1 = pnand %p995_p0, %p989_p11 }
  0x21   :  { %999 = shalt.err (!%p996_p1)
}
  0x22   :  { %24 = dma.hbm_to_vmem [thread:$0]  %s1498_s1, 128, %s1084_s18, [#allocation5], %s1052_s27, %s1052_s27, %s1053_s28  }
  0x23   :  { %s1054_s14 = smov [#allocation9]   ;;  %s1000_s19 = scalar_lea.hbm %s1500_s3, 512 }
  0x24   :  { %s42_s15 = sshll.u32 %s1054_s14, 4  ;;  %p1001_p2 = scmp.ne.s32.totalorder %s1500_s3, %s1000_s19  ;;  %s43_s15 = int_to_ptr.vmem [resolvable:$true] %s42_s15 }
  0x25   :  { %p1004_p3 = scmp.lt.u32.totalorder %s1000_s19, %s1500_s3 }
  0x27   :  { %p1006_p4 = pnand %p1004_p3, %p1001_p2 }
  0x29   :  { %1009 = shalt.err (!%p1006_p4)
}
  0x2a   :  { %s1010_s24 = scalar_lea.vmem %s43_s15, 512  ;;  %p1015_p6 = scmp.lt.s32.totalorder %s43_s15, %s43_s15 }
  0x2b   :  { %p1011_p5 = scmp.ne.s32.totalorder %s43_s15, %s1010_s24  ;;  %p1016_p7 = scmp.lt.s32.totalorder %s1010_s24, %s1010_s24 }
  0x2d   :  { %p1017_p8 = por %p1016_p7, %p1015_p6 }
  0x2f   :  { %p1018_p9 = pnand %p1017_p8, %p1011_p5 }
  0x31   :  { %1021 = shalt.err (!%p1018_p9)
}
  0x32   :  { %s1055_s1 = smov 64   ;;  %s1056_s18 = smov 4  }
  0x33   :  { %48 = dma.hbm_to_vmem [thread:$0]  %s1500_s3, 512, %s43_s15, [#allocation8], %s1055_s1, %s1055_s1, %s1056_s18  }
  0x34   :  { %1044 = dma.done.wait [#allocation5], 128  }
  0x35   :  { %1045 = vsyncadd [#allocation5], 4294967168 }
  0x36   :  { %1046 = dma.done.wait [#allocation8], 640  }
  0x37   :  { %1047 = vsyncadd [#allocation8], 4294966656  ;;  %vm91_vm0 = vcmask 253952   ;;  %v1127_v0 = vld [vmem:[#allocation4 + $0x2] sm:$0x1]  ;;  %v221_v24 = vlaneseq  ;;  %vm156_vm1 = vcmask 257024  }
  0x38   :  { %v1129_v1 = vld [vmem:[#allocation4] sm:$0x1]  ;;  %v1131_v2 = vld [vmem:[#allocation4 + $0x3] sm:$0x1]  ;;  %v85_v3 = vmul.f32 %v1127_v0, %v1127_v0  ;;  %v1139_v6 = vld [vmem:[#allocation4 + $0x1] sm:$0x1] }
  0x39   :  { %v83_v4 = vmul.f32 %v1129_v1, %v1129_v1  ;;  %v86_v5 = vmul.f32 %v1131_v2, %v1131_v2  ;;  %v84_v7 = vmul.f32 %v1139_v6, %v1139_v6  ;;  %v1143_v8 = vld [vmem:[#allocation4 + $0x5] sm:$0x1]  ;;  %v1145_v9 = vld [vmem:[#allocation4 + $0x4] sm:$0x1]  ;;  %v1155_v16 = vld [vmem:[#allocation4 + $0x7] sm:$0x1] }
  0x3a   :  { %v98_v10 = vsel %vm91_vm0, %v85_v3, 0.0  ;;  %v88_v14 = vmul.f32 %v1143_v8, %v1143_v8  ;;  %v87_v15 = vmul.f32 %v1145_v9, %v1145_v9  ;;  %v1157_v17 = vld [vmem:[#allocation4 + $0x6] sm:$0x1]  ;;  %v90_v20 = vmul.f32 %v1155_v16, %v1155_v16  ;;  %v76_v22 = vld [vmem:[#allocation9 + $0x4] sm:$0xf] }
  0x3b   :  { %v92_v11 = vsel %vm91_vm0, %v83_v4, 0.0  ;;  %99 = vadd.xlane.f32.xlu1 %v98_v10  ;;  %v101_v12 = vsel %vm91_vm0, %v86_v5, 0.0  ;;  %v95_v13 = vsel %vm91_vm0, %v84_v7, 0.0  ;;  %v89_v21 = vmul.f32 %v1157_v17, %v1157_v17  ;;  %v75_v23 = vld [vmem:[#allocation9] sm:$0xf] }
  0x3c   :  { %93 = vadd.xlane.f32.xlu0 %v92_v11  ;;  %v107_v18 = vsel %vm91_vm0, %v88_v14, 0.0  ;;  %v104_v19 = vsel %vm91_vm0, %v87_v15, 0.0  ;;  %v113_v25 = vsel %vm91_vm0, %v90_v20, 0.0  ;;  %v149_v27 = vmul.f32 %v76_v22, %v76_v22  ;;  %v78_v29 = vld [vmem:[#allocation9 + $0xc] sm:$0xf] }
  0x3d   :  { %v110_v26 = vsel %vm91_vm0, %v89_v21, 0.0  ;;  %v148_v28 = vmul.f32 %v75_v23, %v75_v23  ;;  %v77_v30 = vld [vmem:[#allocation9 + $0x8] sm:$0xf]  ;;  %v1168_v31 = vshrl.u32 %v221_v24, 7  ;;  %v151_v34 = vmul.f32 %v78_v29, %v78_v29  ;;  %v80_v36 = vld [vmem:[#allocation9 + $0x14] sm:$0xf] }
  0x3e   :  { %v160_v32 = vsel %vm156_vm1, %v149_v27, 0.0  ;;  %v150_v35 = vmul.f32 %v77_v30, %v77_v30  ;;  %v79_v37 = vld [vmem:[#allocation9 + $0x10] sm:$0xf]  ;;  %v153_v41 = vmul.f32 %v80_v36, %v80_v36  ;;  %v82_v43 = vld [vmem:[#allocation9 + $0x1c] sm:$0xf]  ;;  %vm456_vm2 = vcmask 1041409  }
  0x3f   :  { %102 = vadd.xlane.f32.xlu1 %v101_v12  ;;  %v157_v33 = vsel %vm156_vm1, %v148_v28, 0.0  ;;  %v1173_v38 = vsub.s32 0, %v1168_v31  ;;  %v166_v39 = vsel %vm156_vm1, %v151_v34, 0.0  ;;  %v152_v42 = vmul.f32 %v79_v37, %v79_v37  ;;  %v81_v44 = vld [vmem:[#allocation9 + $0x18] sm:$0xf] }
  0x40   :  { %96 = vadd.xlane.f32.xlu0 %v95_v13  ;;  %v163_v40 = vsel %vm156_vm1, %v150_v35, 0.0  ;;  %v172_v47 = vsel %vm156_vm1, %v153_v41, 0.0  ;;  %v155_v49 = vmul.f32 %v82_v43, %v82_v43  ;;  %v154_v50 = vmul.f32 %v81_v44, %v81_v44  ;;  %v68_v15 = vld [vmem:[#allocation7 + $0x1] sm:$0x1] }
  0x41   :  { %v228_v45 = vrot.slane %v1139_v6, %v1173_v38  ;;  %v224_v46 = vrot.slane %v1129_v1, %v1173_v38  ;;  %v169_v48 = vsel %vm156_vm1, %v152_v42, 0.0  ;;  %v236_v55 = vrot.slane %v1131_v2, %v1173_v38 }
  0x42   :  { %v178_v53 = vsel %vm156_vm1, %v155_v49, 0.0  ;;  %v175_v54 = vsel %vm156_vm1, %v154_v50, 0.0  ;;  %v232_v56 = vrot.slane %v1127_v0, %v1173_v38  ;;  %v244_v58 = vrot.slane %v1143_v8, %v1173_v38 }
  0x43   :  { %108 = vadd.xlane.f32.xlu1 %v107_v18  ;;  %v262_v51 = vmul.f32 %v228_v45, %v76_v22  ;;  %v261_v52 = vmul.f32 %v224_v46, %v75_v23  ;;  %v264_v60 = vmul.f32 %v236_v55, %v78_v29  ;;  %v240_v62 = vrot.slane %v1145_v9, %v1173_v38  ;;  %v67_v18 = vld [vmem:[#allocation7] sm:$0x1]  ;;  %v70_v23 = vld [vmem:[#allocation7 + $0x3] sm:$0x1] }
  0x44   :  { %105 = vadd.xlane.f32.xlu0 %v104_v19  ;;  %v263_v61 = vmul.f32 %v232_v56, %v77_v30  ;;  %v266_v63 = vmul.f32 %v244_v58, %v80_v36  ;;  %v252_v3 = vrot.slane %v1155_v16, %v1173_v38  ;;  %v248_v10 = vrot.slane %v1157_v17, %v1173_v38  ;;  %v72_v30 = vld [vmem:[#allocation7 + $0x5] sm:$0x1] }
  0x45   :  { %v272_v57 = vsel %vm156_vm1, %v262_v51, 0.0  ;;  %v269_v59 = vsel %vm156_vm1, %v261_v52, 0.0  ;;  %v278_v4 = vsel %vm156_vm1, %v264_v60, 0.0  ;;  %v265_v7 = vmul.f32 %v240_v62, %v79_v37  ;;  %v1209_v37 = vld [vmem:[#allocation7 + $0x7] sm:$0x1] }
  0x46   :  { %v275_v5 = vsel %vm156_vm1, %v263_v61, 0.0  ;;  %v284_v11 = vsel %vm156_vm1, %v266_v63, 0.0  ;;  %v268_v13 = vmul.f32 %v252_v3, %v82_v43  ;;  %v267_v14 = vmul.f32 %v248_v10, %v81_v44 }
  0x47   :  { %114 = vadd.xlane.f32.xlu1 %v113_v25  ;;  %v281_v12 = vsel %vm156_vm1, %v265_v7, 0.0  ;;  %v117_v21 = vmul.f32 %v68_v15, %v68_v15  ;;  %v116_v22 = vmul.f32 %v67_v18, %v67_v18  ;;  %v69_v25 = vld [vmem:[#allocation7 + $0x2] sm:$0x1]  ;;  %v119_v28 = vmul.f32 %v70_v23, %v70_v23 }
  0x48   :  { %111 = vadd.xlane.f32.xlu0 %v110_v26  ;;  %v290_v19 = vsel %vm156_vm1, %v268_v13, 0.0  ;;  %v287_v20 = vsel %vm156_vm1, %v267_v14, 0.0  ;;  %v118_v29 = vmul.f32 %v69_v25, %v69_v25  ;;  %v121_v35 = vmul.f32 %v72_v30, %v72_v30 }
  0x49   :  { %v127_v26 = vsel %vm91_vm0, %v117_v21, 0.0  ;;  %v124_v27 = vsel %vm91_vm0, %v116_v22, 0.0  ;;  %v123_v42 = vmul.f32 %v1209_v37, %v1209_v37  ;;  %v182_v46 = vmul.f32 %v68_v15, %v1139_v6 }
  0x4a   :  { %v130_v34 = vsel %vm91_vm0, %v118_v29, 0.0  ;;  %v184_v50 = vmul.f32 %v70_v23, %v1131_v2  ;;  %v183_v51 = vmul.f32 %v69_v25, %v1127_v0  ;;  %v309_v15 = vstv %s1497_s0  ;;  %s1058_s0 = smov [#allocation10]  }
  0x4b   :  { %161 = vadd.xlane.f32.xlu1 %v160_v32  ;;  %v71_v32 = vld [vmem:[#allocation7 + $0x4] sm:$0x1]  ;;  %v145_v44 = vsel %vm91_vm0, %v123_v42, 0.0  ;;  %vm458_vm3 = vcmask 1042434   ;;  %vm460_vm4 = vcmask 1043459   ;;  %vm462_vm5 = vcmask 1044484  }
  0x4c   :  { %158 = vadd.xlane.f32.xlu0 %v157_v33  ;;  %v133_v33 = vsel %vm91_vm0, %v119_v28, 0.0  ;;  %v120_v36 = vmul.f32 %v71_v32, %v71_v32  ;;  %v198_v52 = vsel %vm91_vm0, %v184_v50, 0.0  ;;  %v185_v6 = vmul.f32 %v71_v32, %v1145_v9  ;;  %s839_s28 = sshll.u32 %s1058_s0, 4  ;;  %s840_s28 = int_to_ptr.vmem [resolvable:$true] %s839_s28 }
  0x4d   :  { %v423_v32 = vand.u32 127, %v221_v24  ;;  %vm464_vm6 = vcmask 1045509   ;;  %vm466_vm7 = vcmask 1046534   ;;  %vm468_vm8 = vcmask 1047559   ;;  %s1022_s29 = scalar_lea.vmem %s840_s28, 128  ;;  %p1027_p11 = scmp.lt.s32.totalorder %s840_s28, %s840_s28 }
  0x4e   :  { %v136_v41 = vsel %vm91_vm0, %v120_v36, 0.0  ;;  %vm471_vm9 = vcmask 31744   ;;  %p1023_p10 = scmp.ne.s32.totalorder %s840_s28, %s1022_s29  ;;  %p1028_p12 = scmp.lt.s32.totalorder %s1022_s29, %s1022_s29 }
  0x4f   :  { %167 = vadd.xlane.f32.xlu1 %v166_v39  ;;  %v73_v39 = vld [vmem:[#allocation7 + $0x6] sm:$0x1] }
  0x50   :  { %164 = vadd.xlane.f32.xlu0 %v163_v40  ;;  %v139_v40 = vsel %vm91_vm0, %v121_v35, 0.0  ;;  %v122_v43 = vmul.f32 %v73_v39, %v73_v39  ;;  %v187_v2 = vmul.f32 %v73_v39, %v1157_v17  ;;  %p1029_p13 = por %p1028_p12, %p1027_p11 }
  0x52   :  { %v142_v45 = vsel %vm91_vm0, %v122_v43, 0.0  ;;  %v207_v0 = vsel %vm91_vm0, %v187_v2, 0.0  ;;  %p1030_p0 = pnand %p1029_p13, %p1023_p10 }
  0x53   :  { %173 = vadd.xlane.f32.xlu1 %v172_v47  ;;  %v181_v47 = vmul.f32 %v67_v18, %v1129_v1  ;;  %v186_v1 = vmul.f32 %v72_v30, %v1143_v8 }
  0x54   :  { %170 = vadd.xlane.f32.xlu0 %v169_v48  ;;  %v192_v48 = vsel %vm91_vm0, %v182_v46, 0.0 }
  0x55   :  { %v189_v49 = vsel %vm91_vm0, %v181_v47, 0.0  ;;  %v204_v55 = vsel %vm91_vm0, %v186_v1, 0.0 }
  0x57   :  { %179 = vadd.xlane.f32.xlu1 %v178_v53  ;;  %v195_v53 = vsel %vm91_vm0, %v183_v51, 0.0 }
  0x58   :  { %176 = vadd.xlane.f32.xlu0 %v175_v54  ;;  %v201_v54 = vsel %vm91_vm0, %v185_v6, 0.0 }
  0x5b   :  { %273 = vadd.xlane.f32.xlu1 %v272_v57 }
  0x5c   :  { %270 = vadd.xlane.f32.xlu0 %v269_v59 }
  0x5f   :  { %279 = vadd.xlane.f32.xlu1 %v278_v4 }
  0x60   :  { %276 = vadd.xlane.f32.xlu0 %v275_v5 }
  0x63   :  { %285 = vadd.xlane.f32.xlu1 %v284_v11 }
  0x64   :  { %282 = vadd.xlane.f32.xlu0 %v281_v12 }
  0x67   :  { %291 = vadd.xlane.f32.xlu1 %v290_v19 }
  0x68   :  { %288 = vadd.xlane.f32.xlu0 %v287_v20 }
  0x6b   :  { %128 = vadd.xlane.f32.xlu1 %v127_v26 }
  0x6c   :  { %125 = vadd.xlane.f32.xlu0 %v124_v27 }
  0x6f   :  { %134 = vadd.xlane.f32.xlu1 %v133_v33 }
  0x70   :  { %131 = vadd.xlane.f32.xlu0 %v130_v34 }
  0x73   :  { %140 = vadd.xlane.f32.xlu1 %v139_v40 }
  0x74   :  { %137 = vadd.xlane.f32.xlu0 %v136_v41 }
  0x77   :  { %146 = vadd.xlane.f32.xlu1 %v145_v44 }
  0x78   :  { %143 = vadd.xlane.f32.xlu0 %v142_v45 }
  0x7b   :  { %193 = vadd.xlane.f32.xlu1 %v192_v48 }
  0x7c   :  { %190 = vadd.xlane.f32.xlu0 %v189_v49  ;;  %v1250_v49 = vsub.s32 %v423_v32, %v1168_v31 }
  0x7f   :  { %199 = vadd.xlane.f32.xlu1 %v198_v52 }
  0x80   :  { %196 = vadd.xlane.f32.xlu0 %v195_v53 }
  0x83   :  { %202 = vadd.xlane.f32.xlu1 %v201_v54 }
  0x84   :  { %205 = vadd.xlane.f32.xlu0 %v204_v55 }
  0x87   :  { %208 = vadd.xlane.f32.xlu1 %v207_v0 }
  0xc8   :  { %v100_v56 = vpop.xlane.xlu1 %99 }
  0xc9   :  { %v94_v57 = vpop.xlane.xlu0 %93 }
  0xca   :  { %860 = vrsqrt.f32 %v94_v57 }
  0xcc   :  { %v103_v58 = vpop.xlane.xlu1 %102 }
  0xcd   :  { %v97_v59 = vpop.xlane.xlu0 %96 }
  0xce   :  { %862 = vrsqrt.f32 %v97_v59 }
  0xcf   :  { %864 = vrsqrt.f32 %v100_v56 }
  0xd0   :  { %v109_v9 = vpop.xlane.xlu1 %108  ;;  %866 = vrsqrt.f32 %v103_v58 }
  0xd1   :  { %v106_v60 = vpop.xlane.xlu0 %105  ;;  %868 = vrsqrt.f32 %v109_v9 }
  0xd2   :  { %870 = vrsqrt.f32 %v106_v60 }
  0xd4   :  { %v115_v8 = vpop.xlane.xlu1 %114  ;;  %v861_v63 = vpop.eup %860 }
  0xd5   :  { %v112_v61 = vpop.xlane.xlu0 %111  ;;  %v301_v10 = vmin.f32 %v861_v63, 1e+08 }
  0xd7   :  { %v1236_v22 = vmul.f32 %v309_v15, %v301_v10 }
  0xd8   :  { %v162_v62 = vpop.xlane.xlu1 %161  ;;  %v863_v3 = vpop.eup %862 }
  0xd9   :  { %v159_v17 = vpop.xlane.xlu0 %158  ;;  %872 = vrsqrt.f32 %v162_v62  ;;  %v865_v7 = vpop.eup %864  ;;  %v302_v11 = vmin.f32 %v863_v3, 1e+08  ;;  %v369_v35 = vrot.slane %v1236_v22, %v1173_v38 }
  0xda   :  { %874 = vrsqrt.f32 %v159_v17  ;;  %v867_v12 = vpop.eup %866  ;;  %v303_v23 = vmin.f32 %v865_v7, 1e+08 }
  0xdb   :  { %876 = vrsqrt.f32 %v115_v8  ;;  %v869_v18 = vpop.eup %868  ;;  %v304_v20 = vmin.f32 %v867_v12, 1e+08  ;;  %v1234_v21 = vmul.f32 %v309_v15, %v302_v11 }
  0xdc   :  { %v168_v4 = vpop.xlane.xlu1 %167  ;;  %878 = vrsqrt.f32 %v112_v61  ;;  %v871_v19 = vpop.eup %870  ;;  %v306_v25 = vmin.f32 %v869_v18, 1e+08  ;;  %v1245_v42 = vmul.f32 %v309_v15, %v303_v23 }
  0xdd   :  { %v165_v5 = vpop.xlane.xlu0 %164  ;;  %880 = vrsqrt.f32 %v168_v4  ;;  %v305_v30 = vmin.f32 %v871_v19, 1e+08  ;;  %v373_v34 = vrot.slane %v1234_v21, %v1173_v38  ;;  %v1243_v36 = vmul.f32 %v309_v15, %v304_v20 }
  0xde   :  { %882 = vrsqrt.f32 %v165_v5  ;;  %v1247_v43 = vmul.f32 %v309_v15, %v306_v25  ;;  %v377_v55 = vrot.slane %v1245_v42, %v1173_v38 }
  0xdf   :  { %v1252_v50 = vmul.f32 %v309_v15, %v305_v30  ;;  %v381_v1 = vrot.slane %v1243_v36, %v1173_v38 }
  0xe0   :  { %v174_v13 = vpop.xlane.xlu1 %173  ;;  %v389_v58 = vrot.slane %v1247_v43, %v1173_v38 }
  0xe1   :  { %v171_v14 = vpop.xlane.xlu0 %170  ;;  %884 = vrsqrt.f32 %v174_v13  ;;  %v385_v8 = vrot.slane %v1252_v50, %v1173_v38 }
  0xe2   :  { %886 = vrsqrt.f32 %v171_v14 }
  0xe3   :  { %v873_v28 = vpop.eup %872 }
  0xe4   :  { %v180_v26 = vpop.xlane.xlu1 %179  ;;  %v875_v29 = vpop.eup %874  ;;  %v343_v44 = vmin.f32 %v873_v28, 1e+08 }
  0xe5   :  { %v177_v27 = vpop.xlane.xlu0 %176  ;;  %v877_v33 = vpop.eup %876  ;;  %888 = vrsqrt.f32 %v180_v26  ;;  %v342_v24 = vmin.f32 %v875_v29, 1e+08 }
  0xe6   :  { %v879_v39 = vpop.eup %878  ;;  %890 = vrsqrt.f32 %v177_v27  ;;  %v308_v48 = vmin.f32 %v877_v33, 1e+08 }
  0xe7   :  { %v881_v47 = vpop.eup %880  ;;  %v307_v52 = vmin.f32 %v879_v39, 1e+08 }
  0xe8   :  { %v274_v40 = vpop.xlane.xlu1 %273  ;;  %v883_v51 = vpop.eup %882  ;;  %v345_v56 = vmin.f32 %v881_v47, 1e+08  ;;  %v1266_v61 = vmul.f32 %v309_v15, %v308_v48 }
  0xe9   :  { %v271_v41 = vpop.xlane.xlu0 %270  ;;  %v399_v45 = vmul.f32 %v373_v34, %v274_v40  ;;  %v344_v9 = vmin.f32 %v883_v51, 1e+08  ;;  %v1274_v3 = vmul.f32 %v309_v15, %v307_v52  ;;  %v188_v52 = vmul.f32 %v1209_v37, %v1155_v16 }
  0xea   :  { %v398_v46 = vmul.f32 %v369_v35, %v271_v41  ;;  %v397_v15 = vrot.slane %v1266_v61, %v1173_v38 }
  0xeb   :  { %v1254_v53 = vmul.f32 %v399_v45, %v343_v44  ;;  %v885_v0 = vpop.eup %884  ;;  %v393_v27 = vrot.slane %v1274_v3, %v1173_v38 }
  0xec   :  { %v1256_v6 = vmul.f32 %v398_v46, %v342_v24  ;;  %v280_v54 = vpop.xlane.xlu1 %279  ;;  %v887_v59 = vpop.eup %886  ;;  %v347_v11 = vmin.f32 %v885_v0, 1e+08 }
  0xed   :  { %v277_v2 = vpop.xlane.xlu0 %276  ;;  %v401_v57 = vmul.f32 %v381_v1, %v280_v54  ;;  %v431_v62 = vrot.slane %v1254_v53, %v1250_v49  ;;  %v346_v12 = vmin.f32 %v887_v59, 1e+08 }
  0xee   :  { %v400_v60 = vmul.f32 %v377_v55, %v277_v2  ;;  %v427_v17 = vrot.slane %v1256_v6, %v1250_v49  ;;  %v210_v55 = vsel %vm91_vm0, %v188_v52, 0.0  ;;  %v1057_v2 = vmov 0  }
  0xef   :  { %v1272_v63 = vmul.f32 %v401_v57, %v345_v56  ;;  %v889_v10 = vpop.eup %888  ;;  %859 = vset.pattern.permute.xlu0 %v1057_v2  ;;  %858 = vset.pattern.permute.xlu1 %v1057_v2 }
  0xf0   :  { %v1276_v4 = vmul.f32 %v400_v60, %v344_v9  ;;  %v286_v5 = vpop.xlane.xlu1 %285  ;;  %v891_v18 = vpop.eup %890  ;;  %v457_v23 = vsel %vm456_vm2, %v431_v62, %v427_v17  ;;  %v349_v28 = vmin.f32 %v889_v10, 1e+08 }
  0xf1   :  { %v283_v7 = vpop.xlane.xlu0 %282  ;;  %v403_v13 = vmul.f32 %v389_v58, %v286_v5  ;;  %v439_v19 = vrot.slane %v1272_v63, %v1250_v49  ;;  %v348_v33 = vmin.f32 %v891_v18, 1e+08 }
  0xf2   :  { %v402_v14 = vmul.f32 %v385_v8, %v283_v7  ;;  %v435_v20 = vrot.slane %v1276_v4, %v1250_v49 }
  0xf3   :  { %v1285_v25 = vmul.f32 %v403_v13, %v347_v11 }
  0xf4   :  { %v1287_v26 = vmul.f32 %v402_v14, %v346_v12  ;;  %v459_v29 = vsel %vm458_vm3, %v435_v20, %v457_v23  ;;  %v292_v30 = vpop.xlane.xlu1 %291 }
  0xf5   :  { %v289_v32 = vpop.xlane.xlu0 %288  ;;  %v405_v35 = vmul.f32 %v397_v15, %v292_v30  ;;  %v447_v40 = vrot.slane %v1285_v25, %v1250_v49  ;;  %v461_v41 = vsel %vm460_vm4, %v439_v19, %v459_v29  ;;  %v486_v29 = vsub.s32 2, %v1168_v31 }
  0xf6   :  { %v443_v34 = vrot.slane %v1287_v26, %v1250_v49  ;;  %v404_v39 = vmul.f32 %v393_v27, %v289_v32  ;;  %v490_v30 = vsub.s32 3, %v1168_v31 }
  0xf7   :  { %v1297_v44 = vmul.f32 %v405_v35, %v349_v28  ;;  %v482_v28 = vsub.s32 1, %v1168_v31 }
  0xf8   :  { %v1299_v24 = vmul.f32 %v404_v39, %v348_v33  ;;  %v463_v45 = vsel %vm462_vm5, %v443_v34, %v461_v41  ;;  %v129_v56 = vpop.xlane.xlu1 %128  ;;  %v494_v34 = vsub.s32 4, %v1168_v31 }
  0xf9   :  { %v455_v46 = vrot.slane %v1297_v44, %v1250_v49  ;;  %v465_v48 = vsel %vm464_vm6, %v447_v40, %v463_v45  ;;  %v126_v0 = vpop.xlane.xlu0 %125  ;;  %892 = vrsqrt.f32 %v129_v56 }
  0xfa   :  { %v451_v47 = vrot.slane %v1299_v24, %v1250_v49  ;;  %894 = vrsqrt.f32 %v126_v0 }
  0xfc   :  { %v467_v51 = vsel %vm466_vm7, %v451_v47, %v465_v48  ;;  %v135_v58 = vpop.xlane.xlu1 %134 }
  0xfd   :  { %v469_v1 = vsel %vm468_vm8, %v455_v46, %v467_v51  ;;  %v132_v57 = vpop.xlane.xlu0 %131  ;;  %v498_v51 = vsub.s32 5, %v1168_v31 }
  0xfe   :  { %v472_v54 = vsel %vm471_vm9, %v469_v1, -inf  ;;  %896 = vrsqrt.f32 %v132_v57 }
  0xff   :  { %473 = vmax.xlane.f32.xlu0 %v472_v54  ;;  %898 = vrsqrt.f32 %v135_v58 }
 0x100   :  { %v141_v9 = vpop.xlane.xlu1 %140 }
 0x101   :  { %v138_v59 = vpop.xlane.xlu0 %137 }
 0x102   :  { %900 = vrsqrt.f32 %v138_v59 }
 0x103   :  { %211 = vadd.xlane.f32.xlu0 %v210_v55  ;;  %v893_v17 = vpop.eup %892  ;;  %902 = vrsqrt.f32 %v141_v9 }
 0x104   :  { %v147_v8 = vpop.xlane.xlu1 %146  ;;  %v895_v7 = vpop.eup %894  ;;  %v327_v12 = vmin.f32 %v893_v17, 1e+08 }
 0x105   :  { %v144_v60 = vpop.xlane.xlu0 %143  ;;  %v326_v14 = vmin.f32 %v895_v7, 1e+08 }
 0x106   :  { %904 = vrsqrt.f32 %v144_v60 }
 0x107   :  { %906 = vrsqrt.f32 %v147_v8  ;;  %v502_v8 = vsub.s32 6, %v1168_v31 }
 0x108   :  { %v194_v37 = vpop.xlane.xlu1 %193  ;;  %v897_v10 = vpop.eup %896 }
 0x109   :  { %v191_v16 = vpop.xlane.xlu0 %190  ;;  %v899_v11 = vpop.eup %898  ;;  %v351_v13 = vmul.f32 %v1234_v21, %v194_v37  ;;  %v328_v18 = vmin.f32 %v897_v10, 1e+08 }
 0x10a   :  { %v350_v19 = vmul.f32 %v1236_v22, %v191_v16  ;;  %v329_v32 = vmin.f32 %v899_v11, 1e+08 }
 0x10b   :  { %v1320_v21 = vmul.f32 %v351_v13, %v327_v12 }
 0x10c   :  { %v200_v5 = vpop.xlane.xlu1 %199  ;;  %v901_v23 = vpop.eup %900  ;;  %v1323_v35 = vmul.f32 %v350_v19, %v326_v14 }
 0x10d   :  { %v197_v62 = vpop.xlane.xlu0 %196  ;;  %v353_v33 = vmul.f32 %v1243_v36, %v200_v5  ;;  %v330_v22 = vmin.f32 %v901_v23, 1e+08  ;;  %v903_v41 = vpop.eup %902 }
 0x10e   :  { %v352_v20 = vmul.f32 %v1245_v42, %v197_v62  ;;  %v331_v55 = vmin.f32 %v903_v41, 1e+08 }
 0x10f   :  { %v1335_v48 = vmul.f32 %v353_v33, %v329_v32 }
 0x110   :  { %v203_v27 = vpop.xlane.xlu1 %202  ;;  %v1325_v42 = vmul.f32 %v352_v20, %v328_v18  ;;  %v905_v56 = vpop.eup %904 }
 0x111   :  { %v206_v15 = vpop.xlane.xlu0 %205  ;;  %v354_v39 = vmul.f32 %v1252_v50, %v203_v27  ;;  %v907_v16 = vpop.eup %906  ;;  %v332_v5 = vmin.f32 %v905_v56, 1e+08  ;;  %v506_v27 = vsub.s32 7, %v1168_v31 }
 0x112   :  { %v355_v2 = vmul.f32 %v1247_v43, %v206_v15  ;;  %v333_v19 = vmin.f32 %v907_v16, 1e+08 }
 0x113   :  { %v1353_v57 = vmul.f32 %v354_v39, %v330_v22 }
 0x114   :  { %v209_v60 = vpop.xlane.xlu1 %208  ;;  %v1372_v11 = vmul.f32 %v355_v2, %v331_v55 }
 0x115   :  { %v356_v12 = vmul.f32 %v1274_v3, %v209_v60 }
 0x117   :  { %v1384_v23 = vmul.f32 %v356_v12, %v332_v5 }
 0x18c   :  { %v474_v40 = vpop.xlane.xlu0 %473 }
 0x18d   :  { %v479_v45 = vrot.slane %v474_v40, %v1173_v38  ;;  %v483_v46 = vrot.slane %v474_v40, %v482_v28  ;;  %v487_v36 = vrot.slane %v474_v40, %v486_v29  ;;  %v491_v47 = vrot.slane %v474_v40, %v490_v30 }
 0x18e   :  { %v495_v50 = vrot.slane %v474_v40, %v494_v34  ;;  %v499_v43 = vrot.slane %v474_v40, %v498_v51  ;;  %v503_v20 = vrot.slane %v474_v40, %v502_v8  ;;  %v507_v41 = vrot.slane %v474_v40, %v506_v27 }
 0x18f   :  { %v1341_v52 = vmax.f32 %v1323_v35, %v479_v45  ;;  %v1344_v1 = vmax.f32 %v1320_v21, %v483_v46  ;;  %v1347_v54 = vmax.f32 %v1325_v42, %v487_v36  ;;  %v1351_v0 = vmax.f32 %v1335_v48, %v491_v47 }
 0x190   :  { %v1365_v37 = vmax.f32 %v1353_v57, %v495_v50  ;;  %v212_v13 = vpop.xlane.xlu0 %211  ;;  %v1388_v32 = vmax.f32 %v1384_v23, %v503_v20 }
 0x191   :  { %v551_v58 = vrot.slane %v1341_v52, %v1173_v38  ;;  %v555_v59 = vrot.slane %v1344_v1, %v1173_v38  ;;  %v559_v9 = vrot.slane %v1347_v54, %v1173_v38  ;;  %v563_v7 = vrot.slane %v1351_v0, %v1173_v38 }
 0x193   :  { %v581_v62 = vsub.f32 %v1254_v53, %v555_v59  ;;  %v580_v17 = vsub.f32 %v1256_v6, %v551_v58  ;;  %v582_v10 = vsub.f32 %v1276_v4, %v559_v9  ;;  %v1378_v53 = vmax.f32 %v1372_v11, %v499_v43 }
 0x194   :  { %v567_v6 = vrot.slane %v1365_v37, %v1173_v38  ;;  %v357_v4 = vmul.f32 %v1266_v61, %v212_v13  ;;  %v583_v3 = vsub.f32 %v1272_v63, %v563_v7  ;;  %v575_v63 = vrot.slane %v1388_v32, %v1173_v38 }
 0x195   :  { %v590_v14 = vmul.f32 1.442695, %v581_v62  ;;  %v588_v18 = vmul.f32 1.442695, %v580_v17  ;;  %v592_v15 = vmul.f32 1.442695, %v582_v10  ;;  %v571_v33 = vrot.slane %v1378_v53, %v1173_v38 }
 0x196   :  { %v1392_v22 = vmul.f32 %v357_v4, %v333_v19  ;;  %v594_v39 = vmul.f32 1.442695, %v583_v3  ;;  %v584_v61 = vsub.f32 %v1287_v26, %v567_v6  ;;  %v586_v40 = vsub.f32 %v1299_v24, %v575_v63 }
 0x197   :  { %908 = vpow2.f32 %v590_v14  ;;  %v585_v36 = vsub.f32 %v1285_v25, %v571_v33 }
 0x198   :  { %910 = vpow2.f32 %v588_v18  ;;  %v1400_v45 = vmax.f32 %v1392_v22, %v507_v41  ;;  %v596_v46 = vmul.f32 1.442695, %v584_v61  ;;  %v600_v58 = vmul.f32 1.442695, %v586_v40 }
 0x199   :  { %912 = vpow2.f32 %v592_v15  ;;  %v598_v55 = vmul.f32 1.442695, %v585_v36 }
 0x19a   :  { %914 = vpow2.f32 %v594_v39  ;;  %v579_v26 = vrot.slane %v1400_v45, %v1173_v38 }
 0x19b   :  { %916 = vpow2.f32 %v596_v46 }
 0x19c   :  { %v587_v56 = vsub.f32 %v1297_v44, %v579_v26  ;;  %918 = vpow2.f32 %v598_v55  ;;  %v526_v26 = vsub.f32 %v1325_v42, %v1347_v54 }
 0x19d   :  { %920 = vpow2.f32 %v600_v58  ;;  %v528_v58 = vsub.f32 %v1353_v57, %v1365_v37 }
 0x19e   :  { %v602_v25 = vmul.f32 1.442695, %v587_v56 }
 0x1a0   :  { %922 = vpow2.f32 %v602_v25  ;;  %v529_v25 = vsub.f32 %v1372_v11, %v1378_v53 }
 0x1a1   :  { %v909_v47 = vpop.eup %908 }
 0x1a2   :  { %v911_v50 = vpop.eup %910  ;;  %616 = vperm.xlu0 %859, %v909_v47   ;;  %v524_v47 = vsub.f32 %v1323_v35, %v1341_v52 }
 0x1a3   :  { %613 = vperm.xlu1 %858, %v911_v50   ;;  %v913_v2 = vpop.eup %912  ;;  %v525_v50 = vsub.f32 %v1320_v21, %v1344_v1 }
 0x1a4   :  { %v915_v59 = vpop.eup %914  ;;  %v532_v55 = vmul.f32 1.442695, %v524_v47 }
 0x1a5   :  { %v917_v9 = vpop.eup %916  ;;  %v534_v40 = vmul.f32 1.442695, %v525_v50 }
 0x1a6   :  { %v919_v60 = vpop.eup %918  ;;  %924 = vpow2.f32 %v532_v55 }
 0x1a7   :  { %619 = vperm.xlu1 %858, %v913_v2   ;;  %v921_v16 = vpop.eup %920  ;;  %v536_v2 = vmul.f32 1.442695, %v526_v26  ;;  %926 = vpow2.f32 %v534_v40 }
 0x1a9   :  { %928 = vpow2.f32 %v536_v2 }
 0x1aa   :  { %v923_v43 = vpop.eup %922 }
 0x1ab   :  { %622 = vperm.xlu1 %858, %v915_v59   ;;  %v540_v59 = vmul.f32 1.442695, %v528_v58 }
 0x1af   :  { %625 = vperm.xlu1 %858, %v917_v9   ;;  %v530_v9 = vsub.f32 %v1384_v23, %v1388_v32 }
 0x1b3   :  { %628 = vperm.xlu1 %858, %v919_v60   ;;  %v542_v60 = vmul.f32 1.442695, %v529_v25 }
 0x1b7   :  { %631 = vperm.xlu1 %858, %v921_v16   ;;  %v925_v16 = vpop.eup %924 }
 0x1bb   :  { %634 = vperm.xlu1 %858, %v923_v43  }
 0x221   :  { %v617_v44 = vpop.permute.xlu0 %616 }
 0x222   :  { %v614_v24 = vpop.permute.xlu1 %613  ;;  %v643_v12 = vrot.slane %v617_v44, %v1250_v49 }
 0x223   :  { %v639_v10 = vrot.slane %v614_v24, %v1250_v49  ;;  %v544_v24 = vmul.f32 1.442695, %v530_v9 }
 0x225   :  { %v668_v20 = vsel %vm456_vm2, %v643_v12, %v639_v10  ;;  %v531_v12 = vsub.f32 %v1392_v22, %v1400_v45 }
 0x226   :  { %v620_v62 = vpop.permute.xlu1 %619 }
 0x227   :  { %v647_v13 = vrot.slane %v620_v62, %v1250_v49  ;;  %v927_v62 = vpop.eup %926 }
 0x228   :  { %v929_v10 = vpop.eup %928 }
 0x229   :  { %v669_v4 = vsel %vm458_vm3, %v647_v13, %v668_v20 }
 0x22a   :  { %v623_v17 = vpop.permute.xlu1 %622 }
 0x22b   :  { %v651_v14 = vrot.slane %v623_v17, %v1250_v49 }
 0x22d   :  { %v670_v3 = vsel %vm460_vm4, %v651_v14, %v669_v4 }
 0x22e   :  { %v626_v5 = vpop.permute.xlu1 %625 }
 0x22f   :  { %v655_v18 = vrot.slane %v626_v5, %v1250_v49 }
 0x231   :  { %v671_v33 = vsel %vm462_vm5, %v655_v18, %v670_v3 }
 0x232   :  { %v629_v7 = vpop.permute.xlu1 %628 }
 0x233   :  { %v659_v6 = vrot.slane %v629_v7, %v1250_v49 }
 0x235   :  { %v672_v61 = vsel %vm464_vm6, %v659_v6, %v671_v33  ;;  %v546_v6 = vmul.f32 1.442695, %v531_v12 }
 0x236   :  { %v632_v19 = vpop.permute.xlu1 %631 }
 0x237   :  { %v663_v15 = vrot.slane %v632_v19, %v1250_v49 }
 0x239   :  { %v673_v63 = vsel %vm466_vm7, %v663_v15, %v672_v61 }
 0x23a   :  { %v635_v39 = vpop.permute.xlu1 %634 }
 0x23b   :  { %v667_v41 = vrot.slane %v635_v39, %v1250_v49  ;;  %v527_v49 = vsub.f32 %v1335_v48, %v1351_v0 }
 0x23d   :  { %v674_v46 = vsel %vm468_vm8, %v667_v41, %v673_v63  ;;  %v538_v56 = vmul.f32 1.442695, %v527_v49 }
 0x23e   :  { %v676_v36 = vsel %vm471_vm9, %v674_v46, 0.0 }
 0x23f   :  { %677 = vadd.xlane.f32.xlu1 %v676_v36  ;;  %930 = vpow2.f32 %v538_v56 }
 0x240   :  { %932 = vpow2.f32 %v540_v59 }
 0x241   :  { %934 = vpow2.f32 %v542_v60 }
 0x242   :  { %936 = vpow2.f32 %v544_v24 }
 0x249   :  { %v931_v19 = vpop.eup %930 }
 0x2cc   :  { %v678_v43 = vpop.xlane.xlu1 %677 }
 0x2cd   :  { %v683_v17 = vrot.slane %v678_v43, %v1173_v38  ;;  %v687_v5 = vrot.slane %v678_v43, %v482_v28  ;;  %v691_v44 = vrot.slane %v678_v43, %v486_v29  ;;  %v695_v7 = vrot.slane %v678_v43, %v490_v30  ;;  %v933_v29 = vpop.eup %932 }
 0x2ce   :  { %v699_v28 = vrot.slane %v678_v43, %v494_v34  ;;  %v703_v4 = vrot.slane %v678_v43, %v498_v51  ;;  %v935_v15 = vpop.eup %934  ;;  %v707_v33 = vrot.slane %v678_v43, %v502_v8  ;;  %v711_v47 = vrot.slane %v678_v43, %v506_v27 }
 0x2cf   :  { %v720_v13 = vadd.f32 %v925_v16, %v683_v17  ;;  %v721_v14 = vadd.f32 %v927_v62, %v687_v5  ;;  %v722_v18 = vadd.f32 %v929_v10, %v691_v44  ;;  %v723_v20 = vadd.f32 %v931_v19, %v695_v7  ;;  %v937_v39 = vpop.eup %936 }
 0x2d0   :  { %v724_v30 = vadd.f32 %v933_v29, %v699_v28  ;;  %v725_v3 = vadd.f32 %v935_v15, %v703_v4  ;;  %v726_v36 = vadd.f32 %v937_v39, %v707_v33 }
 0x2d1   :  { %938 = vlog2.f32 %v720_v13 }
 0x2d2   :  { %940 = vlog2.f32 %v721_v14 }
 0x2d3   :  { %942 = vlog2.f32 %v722_v18 }
 0x2d4   :  { %944 = vlog2.f32 %v723_v20 }
 0x2d5   :  { %946 = vpow2.f32 %v546_v6 }
 0x2d6   :  { %948 = vlog2.f32 %v724_v30 }
 0x2d7   :  { %950 = vlog2.f32 %v725_v3 }
 0x2d8   :  { %952 = vlog2.f32 %v726_v36 }
 0x2db   :  { %v939_v61 = vpop.eup %938 }
 0x2dc   :  { %v941_v41 = vpop.eup %940  ;;  %v729_v34 = vmul.f32 0.6931472, %v939_v61 }
 0x2dd   :  { %v943_v63 = vpop.eup %942  ;;  %v731_v46 = vmul.f32 0.6931472, %v941_v41 }
 0x2de   :  { %v744_v51 = vadd.f32 %v729_v34, %v1341_v52  ;;  %v733_v50 = vmul.f32 0.6931472, %v943_v63  ;;  %v945_v26 = vpop.eup %944 }
 0x2df   :  { %v745_v55 = vadd.f32 %v731_v46, %v1344_v1  ;;  %v947_v49 = vpop.eup %946  ;;  %v735_v59 = vmul.f32 0.6931472, %v945_v26 }
 0x2e0   :  { %v752_v8 = vsub.f32 %v744_v51, %v1323_v35  ;;  %v727_v40 = vadd.f32 %v947_v49, %v711_v47  ;;  %v746_v58 = vadd.f32 %v733_v50, %v1347_v54  ;;  %v949_v31 = vpop.eup %948 }
 0x2e1   :  { %v753_v56 = vsub.f32 %v745_v55, %v1320_v21  ;;  %v747_v1 = vadd.f32 %v735_v59, %v1351_v0  ;;  %v737_v25 = vmul.f32 0.6931472, %v949_v31  ;;  %v951_v35 = vpop.eup %950 }
 0x2e2   :  { %v763_v2 = vrot.slane %v752_v8, %v1173_v38  ;;  %954 = vlog2.f32 %v727_v40  ;;  %v754_v27 = vsub.f32 %v746_v58, %v1325_v42  ;;  %v739_v54 = vmul.f32 0.6931472, %v951_v35  ;;  %v953_v16 = vpop.eup %952 }
 0x2e3   :  { %v767_v52 = vrot.slane %v753_v56, %v1173_v38  ;;  %v755_v60 = vsub.f32 %v747_v1, %v1335_v48  ;;  %v748_v21 = vadd.f32 %v737_v25, %v1365_v37  ;;  %v741_v62 = vmul.f32 0.6931472, %v953_v16 }
 0x2e4   :  { %801 = vperm.xlu0 %859, %v763_v2   ;;  %v771_v9 = vrot.slane %v754_v27, %v1173_v38  ;;  %v749_v42 = vadd.f32 %v739_v54, %v1378_v53 }
 0x2e5   :  { %v775_v43 = vrot.slane %v755_v60, %v1173_v38  ;;  %v756_v24 = vsub.f32 %v748_v21, %v1353_v57  ;;  %v750_v48 = vadd.f32 %v741_v62, %v1388_v32 }
 0x2e6   :  { %v757_v5 = vsub.f32 %v749_v42, %v1372_v11 }
 0x2e7   :  { %v779_v17 = vrot.slane %v756_v24, %v1173_v38  ;;  %v758_v7 = vsub.f32 %v750_v48, %v1384_v23 }
 0x2e8   :  { %804 = vperm.xlu0 %859, %v767_v52   ;;  %v783_v37 = vrot.slane %v757_v5, %v1173_v38 }
 0x2e9   :  { %v787_v57 = vrot.slane %v758_v7, %v1173_v38 }
 0x2ec   :  { %807 = vperm.xlu0 %859, %v771_v9   ;;  %v955_v0 = vpop.eup %954 }
 0x2ed   :  { %v743_v44 = vmul.f32 0.6931472, %v955_v0 }
 0x2ef   :  { %v751_v10 = vadd.f32 %v743_v44, %v1400_v45 }
 0x2f0   :  { %810 = vperm.xlu0 %859, %v775_v43  }
 0x2f1   :  { %v759_v53 = vsub.f32 %v751_v10, %v1392_v22 }
 0x2f3   :  { %v791_v12 = vrot.slane %v759_v53, %v1173_v38 }
 0x2f4   :  { %813 = vperm.xlu0 %859, %v779_v17  }
 0x2f8   :  { %816 = vperm.xlu0 %859, %v783_v37  }
 0x2fc   :  { %819 = vperm.xlu0 %859, %v787_v57  }
 0x300   :  { %822 = vperm.xlu0 %859, %v791_v12  }
 0x363   :  { %v802_v11 = vpop.permute.xlu0 %801 }
 0x367   :  { %v805_v13 = vpop.permute.xlu0 %804 }
 0x368   :  { %v824_v20 = vsel %vm456_vm2, %v805_v13, %v802_v11 }
 0x36b   :  { %v808_v32 = vpop.permute.xlu0 %807 }
 0x36c   :  { %v825_v23 = vsel %vm458_vm3, %v808_v32, %v824_v20 }
 0x36f   :  { %v811_v14 = vpop.permute.xlu0 %810 }
 0x370   :  { %v826_v28 = vsel %vm460_vm4, %v811_v14, %v825_v23 }
 0x373   :  { %v814_v18 = vpop.permute.xlu0 %813 }
 0x374   :  { %v827_v22 = vsel %vm462_vm5, %v814_v18, %v826_v28 }
 0x377   :  { %v817_v19 = vpop.permute.xlu0 %816 }
 0x378   :  { %v828_v38 = vsel %vm464_vm6, %v817_v19, %v827_v22 }
 0x37b   :  { %v820_v45 = vpop.permute.xlu0 %819 }
 0x37c   :  { %v829_v6 = vsel %vm466_vm7, %v820_v45, %v828_v38 }
 0x37f   :  { %v823_v29 = vpop.permute.xlu0 %822 }
 0x380   :  { %v830_v30 = vsel %vm468_vm8, %v823_v29, %v829_v6 }
 0x381   :  { %832 = vst [vmem:[#allocation10] sm:$0xff] %v830_v30 }
 0x382   :  { %1033 = shalt.err (!%p1030_p0)
}
 0x383   :  { %s1034_s6 = scalar_lea.hbm %s1501_s4, 128 }
 0x384   :  { %p1035_p1 = scmp.ne.s32.totalorder %s1501_s4, %s1034_s6  ;;  %p1038_p2 = scmp.lt.u32.totalorder %s1034_s6, %s1501_s4 }
 0x386   :  { %p1040_p3 = pnand %p1038_p2, %p1035_p1 }
 0x388   :  { %1043 = shalt.err (!%p1040_p3)
}
 0x389   :  { %842 = dma.vmem_to_hbm [thread:$0]  %s840_s28, 128, %s1501_s4, [#allocation6]  }
 0x38a   :  { %1048 = dma.done.wait [#allocation6], 128  }
 0x38b   :  { %1049 = vsyncadd [#allocation6], 4294967168 }
 0x38c   :  { %846 = vsyncpa [#allocation5], 1 }
 0x38d   :  { %847 = vsyncpa [#allocation8], 1 }
 0x38e   :  { %848 = vsyncpa [#allocation6], 1 }

</bundles_post_ra>
